<compile_context>
chip_gen: v5e
topology: v5e:2x2
jax: 0.10.0
libtpu: 0.0.40
codegen_flags: <defaults>
</compile_context>

<pallas_src>
import functools

import jax
import jax.numpy as jnp
from jax.experimental import pallas as pl
from jax.experimental.pallas import tpu as pltpu


_HIDDEN = 128
# Explicit scoped-VMEM limit: raises v5e's 16 MiB default, and is within the physical
# capacity / scoped defaults of v6e (128/32 MiB) and v7x (64/32 MiB).
_VMEM_LIMIT_BYTES = 32 * 1024 * 1024


def _critic_kernel(x_ref, w1_ref, b1_ref, w2_ref, b2_ref, o_ref):
    """One batch tile of the critic forward pass (natural batch-major layout).

    x_ref  : (tb, S)  state batch tile (consumed directly, no transpose)
    w1_ref : (S,  H)  hidden weight, pre-transposed (== torch hidden.weight.T)
    b1_ref : (1,  H)  hidden bias
    w2_ref : (H,  1)  output weight (== torch out.weight.T)
    b2_ref : (1,)     output bias, scalar in SMEM
    o_ref  : (tb, 1)  value
    """
    # Layer 1 on the MXU. K = S is tiny, but the MXU push/pop occupies a separate VLIW
    # slot that would otherwise sit idle, freeing ~8 of ~12 VALU ops per hidden vreg.
    h = jnp.dot(x_ref[...], w1_ref[...], preferred_element_type=jnp.float32)   # (tb, H)
    h = jnp.maximum(h + b1_ref[...], 0.0)                                       # VPU: bias + ReLU
    # Layer 2 (N = 1) also on the MXU; only the scalar bias add stays on the VPU.
    v = jnp.dot(h, w2_ref[...], preferred_element_type=jnp.float32)             # (tb, 1)
    o_ref[...] = (v + b2_ref[0]).astype(o_ref.dtype)


def _device_kind():
    try:
        return jax.devices()[0].device_kind.lower()
    except Exception:  # pragma: no cover - CPU/interpret fallbacks
        return ""


def _round_up(x, m):
    return ((x + m - 1) // m) * m


def _batch_tile(batch, max_tb):
    """Pick the batch-tile (sublane) size per TPU generation (or honor an override)."""
    if max_tb is not None:
        cap, want_tiles = max(8, (max_tb // 8) * 8), 1
    else:
        kind = _device_kind()
        if "v7" in kind:
            cap, want_tiles = 2048, 2       # >=2 grid steps so both TensorCores get work
        elif "v6" in kind:
            cap, want_tiles = 8192, 1       # big tiles amortize ~0.35us/step grid overhead
        else:                                # v5e or unknown: conservative tile
            cap, want_tiles = 4096, 1
    # Tiny batches: one full-dim block (always layout-legal); the call is
    # dispatch-overhead bound anyway, so splitting would only add grid steps.
    if batch <= 256 or (want_tiles == 1 and batch <= cap):
        return batch
    return min(cap, _round_up(pl.cdiv(batch, want_tiles), 128))


@functools.partial(jax.jit, static_argnames=("max_tb",))
def critic_forward(state, w1, b1, w2, b2, *, max_tb=None):
    """state: (B, S) exactly like the torch module; returns (B, 1)."""
    batch, s = state.shape
    hidden = w1.shape[1]

    tb = _batch_tile(batch, max_tb)
    grid = (pl.cdiv(batch, tb),)

    return pl.pallas_call(
        _critic_kernel,
        out_shape=jax.ShapeDtypeStruct((batch, 1), jnp.float32),
        grid_spec=pltpu.PrefetchScalarGridSpec(
            num_scalar_prefetch=0,
            grid=grid,
            in_specs=[
                pl.BlockSpec((tb, s), lambda i: (i, 0)),        # x: batch-tiled, natural layout
                pl.BlockSpec((s, hidden), lambda i: (0, 0)),    # W1 resident across tiles
                pl.BlockSpec((1, hidden), lambda i: (0, 0)),    # b1 resident
                pl.BlockSpec((hidden, 1), lambda i: (0, 0)),    # w2 resident
                pl.BlockSpec(memory_space=pltpu.SMEM),          # b2 scalar in SMEM
            ],
            out_specs=pl.BlockSpec((tb, 1), lambda i: (i, 0)),
        ),
        compiler_params=pltpu.CompilerParams(
            dimension_semantics=("parallel",),   # batch tiles independent; v7x shards over 2 TCs
            vmem_limit_bytes=_VMEM_LIMIT_BYTES,
        ),
    )(state, w1, b1, w2, b2)


def init_params(key, state_size, hidden_size=_HIDDEN, init_w=0.003):
    """Deterministic init mirroring the torch module.

    hidden layer: torch default (uniform +-1/sqrt(fan_in));
    out layer:    initialize_uniformly -> uniform +-init_w.
    Parameter layouts match what the kernel consumes:
      w1 (S, H) == torch hidden.weight.T, b1 (1, H),
      w2 (H, 1) == torch out.weight.T,    b2 (1,).
    """
    k1, k2, k3, k4 = jax.random.split(key, 4)
    bound1 = 1.0 / jnp.sqrt(jnp.float32(state_size))
    w1 = jax.random.uniform(k1, (state_size, hidden_size), jnp.float32, -bound1, bound1)
    b1 = jax.random.uniform(k2, (1, hidden_size), jnp.float32, -bound1, bound1)
    w2 = jax.random.uniform(k3, (hidden_size, 1), jnp.float32, -init_w, init_w)
    b2 = jax.random.uniform(k4, (1,), jnp.float32, -init_w, init_w)
    return w1, b1, w2, b2


if __name__ == "__main__":
    key = jax.random.PRNGKey(0)
    k_x, k_x2, k_p = jax.random.split(key, 3)

    state_size = 4                                            # small, gym-like state
    w1, b1, w2, b2 = init_params(k_p, state_size)

    def ref_forward(x):
        h = jnp.maximum(x @ w1 + b1, 0.0)
        return h @ w2 + b2

    # MXU f32 matmuls may use multi-pass accumulation; keep a small tolerance margin.
    TOL = dict(atol=5e-4, rtol=2e-3)

    # small batch (single full-dim block)
    x = jax.random.normal(k_x, (8, state_size), jnp.float32)
    out = jax.block_until_ready(critic_forward(x, w1, b1, w2, b2))
    assert out.shape == (8, 1)
    assert jnp.allclose(out, ref_forward(x), **TOL)

    # non-multiple-of-8 batch, still a single block
    x2 = jax.random.normal(k_x2, (200, state_size), jnp.float32)
    out2 = jax.block_until_ready(critic_forward(x2, w1, b1, w2, b2))
    assert out2.shape == (200, 1)
    assert jnp.allclose(out2, ref_forward(x2), **TOL)

    # multi-tile grid with a partial last tile (200 = 128 + 72): locks in the
    # padded-row masking behaviour the reviewers flagged.
    out3 = jax.block_until_ready(critic_forward(x2, w1, b1, w2, b2, max_tb=128))
    assert out3.shape == (200, 1)
    assert jnp.allclose(out3, ref_forward(x2), **TOL)

    print("KERNEL_OK")
</pallas_src>

<mosaic_0001>
module attributes {stable_mosaic.version = 11 : i64} {
  func.func @_critic_kernel(%arg0: i32, %arg1: memref<8x4xf32, #tpu.memory_space<vmem>>, %arg2: memref<4x128xf32, #tpu.memory_space<vmem>>, %arg3: memref<1x128xf32, #tpu.memory_space<vmem>>, %arg4: memref<128x1xf32, #tpu.memory_space<vmem>>, %arg5: memref<1xf32, #tpu.memory_space<smem>>, %arg6: memref<8x1xf32, #tpu.memory_space<vmem>>) attributes {dimension_semantics = [#tpu.dimension_semantics<parallel>], iteration_bounds = array<i64: 1>, scalar_prefetch = 0 : i64, scratch_operands = 0 : i64, tpu.core_type = #tpu.core_type<tc>, window_params = [{transform_indices = @transform_0, window_bounds = array<i64: 8, 4>}, {pipeline_mode = #tpu.pipeline_mode<synchronous>, transform_indices = @transform_1, window_bounds = array<i64: 4, 128>}, {pipeline_mode = #tpu.pipeline_mode<synchronous>, transform_indices = @transform_2, window_bounds = array<i64: 1, 128>}, {pipeline_mode = #tpu.pipeline_mode<synchronous>, transform_indices = @transform_3, window_bounds = array<i64: 128, 1>}, {transform_indices = @transform_4, window_bounds = array<i64: 1>}, {transform_indices = @transform_5, window_bounds = array<i64: 8, 1>}]} {
    %c0 = arith.constant 0 : index
    %c0_0 = arith.constant 0 : index
    %0 = vector.load %arg1[%c0, %c0_0] : memref<8x4xf32, #tpu.memory_space<vmem>>, vector<8x4xf32>
    %c0_1 = arith.constant 0 : index
    %c0_2 = arith.constant 0 : index
    %1 = vector.load %arg2[%c0_1, %c0_2] : memref<4x128xf32, #tpu.memory_space<vmem>>, vector<4x128xf32>
    %cst = arith.constant dense<0.000000e+00> : vector<8x128xf32>
    %2 = tpu.matmul %0, %1, %cst {dimension_numbers = #tpu.dot_dimension_numbers<[1], [0], [0], [1], [0, 0, 1, 1], [], []>} : vector<8x4xf32>, vector<4x128xf32>, vector<8x128xf32> -> vector<8x128xf32>
    %c0_3 = arith.constant 0 : index
    %c0_4 = arith.constant 0 : index
    %3 = vector.load %arg3[%c0_3, %c0_4] : memref<1x128xf32, #tpu.memory_space<vmem>>, vector<1x128xf32>
    %4 = vector.broadcast %3 : vector<1x128xf32> to vector<8x128xf32>
    %5 = arith.addf %2, %4 : vector<8x128xf32>
    %cst_5 = arith.constant 0.000000e+00 : f32
    %6 = vector.broadcast %cst_5 : f32 to vector<8x128xf32>
    %7 = arith.maximumf %5, %6 : vector<8x128xf32>
    %c0_6 = arith.constant 0 : index
    %c0_7 = arith.constant 0 : index
    %8 = vector.load %arg4[%c0_6, %c0_7] : memref<128x1xf32, #tpu.memory_space<vmem>>, vector<128x1xf32>
    %cst_8 = arith.constant dense<0.000000e+00> : vector<8x1xf32>
    %9 = tpu.matmul %7, %8, %cst_8 {dimension_numbers = #tpu.dot_dimension_numbers<[1], [0], [0], [1], [0, 0, 1, 1], [], []>} : vector<8x128xf32>, vector<128x1xf32>, vector<8x1xf32> -> vector<8x1xf32>
    %c0_9 = arith.constant 0 : index
    %10 = memref.load %arg5[%c0_9] : memref<1xf32, #tpu.memory_space<smem>>
    %11 = vector.broadcast %10 : f32 to vector<8x1xf32>
    %12 = arith.addf %9, %11 : vector<8x1xf32>
    %c0_10 = arith.constant 0 : index
    %c0_11 = arith.constant 0 : index
    %13 = vector.load %arg6[%c0_10, %c0_11] : memref<8x1xf32, #tpu.memory_space<vmem>>, vector<8x1xf32>
    tpu.vector_store %arg6[%c0_10, %c0_11], %12 {strides = array<i32>} : memref<8x1xf32, #tpu.memory_space<vmem>>, vector<8x1xf32>,
    return
  }
  func.func @transform_0(%arg0: i32) -> (i32, i32) {
    %c0_i32 = arith.constant 0 : i32
    %c0_i32_0 = arith.constant 0 : i32
    return %arg0, %c0_i32 : i32, i32
  }
  func.func @transform_1(%arg0: i32) -> (i32, i32) {
    %c0_i32 = arith.constant 0 : i32
    %c0_i32_0 = arith.constant 0 : i32
    %c0_i32_1 = arith.constant 0 : i32
    return %c0_i32, %c0_i32_0 : i32, i32
  }
  func.func @transform_2(%arg0: i32) -> (i32, i32) {
    %c0_i32 = arith.constant 0 : i32
    %c0_i32_0 = arith.constant 0 : i32
    %c0_i32_1 = arith.constant 0 : i32
    return %c0_i32, %c0_i32_0 : i32, i32
  }
  func.func @transform_3(%arg0: i32) -> (i32, i32) {
    %c0_i32 = arith.constant 0 : i32
    %c0_i32_0 = arith.constant 0 : i32
    %c0_i32_1 = arith.constant 0 : i32
    return %c0_i32, %c0_i32_0 : i32, i32
  }
  func.func @transform_4(%arg0: i32) -> i32 {
    %c0_i32 = arith.constant 0 : i32
    %c0_i32_0 = arith.constant 0 : i32
    return %c0_i32 : i32
  }
  func.func @transform_5(%arg0: i32) -> (i32, i32) {
    %c0_i32 = arith.constant 0 : i32
    %c0_i32_0 = arith.constant 0 : i32
    return %arg0, %c0_i32 : i32, i32
  }
}

</mosaic_0001>

<bundles_post_ra>
// kernel: critic_forward.1
= control target key start
LH: loop header
LB: loop body
LE: loop exit
PB: predicated region body
PF: predicated region fallthrough
CT: control target
= control target key end

     0   :  { %vm31_vm0 = vcmask 1043456   ;;  %vm27_vm1 = vcmask 31744   ;;  %vm94_vm2 = vcmask 7168   ;;  %s196_s1 = inlined_call_operand.vmem [shape: f32[4,128], index: 1, kind: input, shape index: {}]   ;;  %s197_s0 = inlined_call_operand.vmem [shape: f32[8,4], index: 0, kind: input, shape index: {}]   ;;  %s198_s3 = inlined_call_operand.vmem [shape: f32[128,1], index: 3, kind: input, shape index: {}]   ;;  %s199_s2 = inlined_call_operand.vmem [shape: f32[1,128], index: 2, kind: input, shape index: {}]   ;;  %s200_s4 = inlined_call_operand.<no memory space> [shape: f32[1], index: 4, kind: input, shape index: {}]   ;;  %s201_s5 = inlined_call_operand.vmem [shape: f32[8,1], index: 5, kind: output, shape index: {}]  }
   0x1   :  { %v22_v0 = vld [vmem:[%s196_s1] sm:$0xf]  ;;  %v71_v2 = vld [vmem:[%s198_s3 + $0x78] sm:$0xff]  ;;  %v70_v3 = vld [vmem:[%s198_s3 + $0x70] sm:$0xff]  ;;  %v73_v22 = vstv %s200_s4 }
   0x2   :  { %v21_v1 = vld [vmem:[%s197_s0] sm:$0xff]  ;;  %100 = vmatpush.msk.msra.mxu0 %vm31_vm0, %v22_v0  ;;  %74 = vmatpush.msra.mxu1 %v71_v2  ;;  %v69_v4 = vld [vmem:[%s198_s3 + $0x68] sm:$0xff]  ;;  %v67_v6 = vld [vmem:[%s198_s3 + $0x58] sm:$0xff] }
   0x3   :  { %101 = vmatmul.msk.f32.vlgmr.msra.gmra.mxu0 %vm27_vm1, %v21_v1  ;;  %v68_v5 = vld [vmem:[%s198_s3 + $0x60] sm:$0xff]  ;;  %v66_v7 = vld [vmem:[%s198_s3 + $0x50] sm:$0xff]  ;;  %v65_v8 = vld [vmem:[%s198_s3 + $0x48] sm:$0xff] }
   0x4   :  { %75 = vmatpush.msra.mxu1 %v70_v3  ;;  %v64_v9 = vld [vmem:[%s198_s3 + $0x40] sm:$0xff]  ;;  %v63_v10 = vld [vmem:[%s198_s3 + $0x38] sm:$0xff]  ;;  %v62_v11 = vld [vmem:[%s198_s3 + $0x30] sm:$0xff] }
   0x5   :  { %v61_v12 = vld [vmem:[%s198_s3 + $0x28] sm:$0xff]  ;;  %v60_v13 = vld [vmem:[%s198_s3 + $0x20] sm:$0xff]  ;;  %v59_v14 = vld [vmem:[%s198_s3 + $0x18] sm:$0xff] }
   0x6   :  { %76 = vmatpush.msra.mxu1 %v69_v4  ;;  %v58_v15 = vld [vmem:[%s198_s3 + $0x10] sm:$0xff]  ;;  %v57_v16 = vld [vmem:[%s198_s3 + $0x8] sm:$0xff]  ;;  %v56_v17 = vld [vmem:[%s198_s3] sm:$0xff] }
   0x7   :  { %v102_v18 = vld [vmem:[%s199_s2] ss:$0 sm:$0xff] }
   0x8   :  { %77 = vmatpush.msra.mxu1 %v68_v5 }
   0xa   :  { %78 = vmatpush.msra.mxu1 %v67_v6 }
   0xc   :  { %79 = vmatpush.msra.mxu1 %v66_v7 }
   0xe   :  { %80 = vmatpush.msra.mxu1 %v65_v8 }
  0x10   :  { %81 = vmatpush.msra.mxu1 %v64_v9 }
  0x12   :  { %82 = vmatpush.msra.mxu1 %v63_v10 }
  0x14   :  { %83 = vmatpush.msra.mxu1 %v62_v11 }
  0x16   :  { %84 = vmatpush.msra.mxu1 %v61_v12 }
  0x18   :  { %85 = vmatpush.msra.mxu1 %v60_v13 }
  0x1a   :  { %86 = vmatpush.msra.mxu1 %v59_v14 }
  0x1c   :  { %87 = vmatpush.msra.mxu1 %v58_v15 }
  0x1e   :  { %88 = vmatpush.msra.mxu1 %v57_v16 }
  0x20   :  { %89 = vmatpush.msra.mxu1 %v56_v17 }
  0x80   :  { %v52_v19 = vpop.f32.mrf.mxu0 }
  0x81   :  { %v53_v20 = vadd.f32 %v102_v18, %v52_v19 }
  0x83   :  { %v55_v21 = vmax.f32 %v53_v20, 0.0 }
  0x85   :  { %90 = vmatmul.f32.vlgmr.msra.gmra.mxu1 %v55_v21 }
 0x102   :  { %v91_v23 = vpop.f32.mrf.mxu1 }
 0x103   :  { %v92_v24 = vadd.f32 %v91_v23, %v73_v22 }
 0x105   :  { %95 = vst.msk [vmem:[%s201_s5] sm:$0xff] %vm94_vm2, %v92_v24 }

</bundles_post_ra>
